<compile_context>
chip_gen: v5e
topology: v5e:2x2
jax: 0.10.0
libtpu: 0.0.40
codegen_flags: <defaults>
</compile_context>

<pallas_src>
import functools

import jax
import jax.numpy as jnp
from jax.experimental import pallas as pl
from jax.experimental.pallas import tpu as pltpu

USE_BF16_MATMUL = False  # f32 keeps PyTorch parity; True ~2-3x MXU rate when compute-bound.


def _convblock_kernel(x_ref, w_ref, b_ref, a_ref, o_ref, *, wp, out_len, nb):
    """Fused 3x3 same-conv + bias + PReLU for `nb` images.

    x_ref : (nb, cin_pad, Lpad)     VMEM  zero-padded, spatially-flattened images
    w_ref : (3, Cout, 3*cin_pad)    VMEM  per-ky weight slabs, kx-major / ci-minor
    b_ref : (Cout, 1)               VMEM  bias
    a_ref : (Cout, 1)               VMEM  PReLU slope (broadcast if scalar)
    o_ref : (nb, Cout, out_len)     VMEM  wide-domain flat output (lane-dense)
    """
    bias = b_ref[...]
    alpha = a_ref[...]
    for i in range(nb):              # static unroll: nb is a small compile-time int
        xi = x_ref[i]                # (cin_pad, Lpad)
        y = None
        for ky in range(3):          # 3 accumulating K=3*cin_pad MXU dots (no 9x buffer)
            taps = jnp.concatenate(
                [xi[:, ky * wp + kx: ky * wp + kx + out_len] for kx in range(3)],
                axis=0)              # (3*cin_pad, out_len); 8-row pieces -> vreg moves
            lhs = w_ref[ky]          # (Cout, 3*cin_pad)
            if USE_BF16_MATMUL:
                lhs = lhs.astype(jnp.bfloat16)
                taps = taps.astype(jnp.bfloat16)
            d = jnp.dot(lhs, taps, preferred_element_type=jnp.float32)
            y = d if y is None else y + d
        y = y + bias                                  # (Cout,1) lane-broadcast
        y = jnp.where(y >= 0, y, alpha * y)           # PReLU(init=0.5)
        o_ref[i] = y.astype(o_ref.dtype)


def conv_block_forward(params, x, *, images_per_step=None):
    """ConvBlock forward: PReLU(conv3x3_same(x) + b).  x: (N, Cin, H, W) f32."""
    N, Cin, H, W = x.shape
    w = params["w"]                                   # (Cout, Cin, 3, 3) OIHW
    b = params["b"]                                   # (Cout,)
    alpha = params["alpha"]                           # scalar (or (Cout,) per-channel)
    Cout = w.shape[0]

    LANE, SUB = 128, 8
    Wp = W + 2                                        # padded width
    Lout = H * Wp                                     # valid wide-domain flat length
    Lout_pad = ((Lout + LANE - 1) // LANE) * LANE     # lane-dense compute/store length
    Lpad = 2 * Wp + 2 + Lout_pad                      # covers the largest tap slice
    cin_pad = ((Cin + SUB - 1) // SUB) * SUB          # sublane-aligned channel count

    # --- Host-side packing (one-time) ------------------------------------------
    # Zero pad 1 row/col on each side, flatten spatial, then pad the flat tail and
    # the channel axis so every in-kernel tap slice is in bounds and sublane-aligned.
    xpad = jnp.pad(x, ((0, 0), (0, 0), (1, 1), (1, 1))).astype(jnp.float32)
    x_flat = xpad.reshape(N, Cin, (H + 2) * Wp)
    x_flat = jnp.pad(x_flat, ((0, 0), (0, cin_pad - Cin), (0, Lpad - (H + 2) * Wp)))

    # OIHW -> (ky, Cout, kx*cin_pad + ci): matches the in-kernel tap stacking order.
    w_k = jnp.transpose(w, (2, 0, 3, 1)).astype(jnp.float32)     # (3, Cout, 3, Cin)
    w_k = jnp.pad(w_k, ((0, 0), (0, 0), (0, 0), (0, cin_pad - Cin)))
    w3 = w_k.reshape(3, Cout, 3 * cin_pad)
    b2 = b.reshape(Cout, 1).astype(jnp.float32)
    a2 = jnp.broadcast_to(jnp.asarray(alpha, jnp.float32).reshape(-1, 1), (Cout, 1))

    # --- Grid / block sizing ----------------------------------------------------
    bytes_in = cin_pad * Lpad * 4
    bytes_out = Cout * Lout_pad * 4
    if images_per_step is None:
        budget = 24 << 20                              # per-step working-set budget
        cap_vmem = max(1, budget // (2 * (bytes_in + bytes_out)))
        cap_cores = max(1, N // 2)                     # keep >=2 steps for v7x megacore
        nb = int(min(N, cap_vmem, cap_cores))
    else:
        nb = int(min(images_per_step, N))
    while N % nb:                                      # largest divisor of N <= cap
        nb -= 1
    grid = (N // nb,)

    # Double-buffered blocked operands + resident weights/bias + headroom.
    vmem_needed = (2 * nb * (bytes_in + bytes_out) + w3.size * 4
                   + 2 * Cout * 4 + (2 << 20))
    vmem_limit = int(min(max(vmem_needed, 16 << 20), 60 << 20))   # under v7x's 64 MiB

    kernel = functools.partial(_convblock_kernel, wp=Wp, out_len=Lout_pad, nb=nb)
    out_flat = pl.pallas_call(
        kernel,
        grid=grid,
        in_specs=[
            pl.BlockSpec((nb, cin_pad, Lpad), lambda g: (g, 0, 0)),
            pl.BlockSpec((3, Cout, 3 * cin_pad), lambda g: (0, 0, 0)),
            pl.BlockSpec((Cout, 1), lambda g: (0, 0)),
            pl.BlockSpec((Cout, 1), lambda g: (0, 0)),
        ],
        out_specs=pl.BlockSpec((nb, Cout, Lout_pad), lambda g: (g, 0, 0)),
        out_shape=jax.ShapeDtypeStruct((N, Cout, Lout_pad), jnp.float32),
        compiler_params=pltpu.CompilerParams(
            dimension_semantics=("parallel",),
            vmem_limit_bytes=vmem_limit),
    )(x_flat, w3, b2, a2)
    # TODO(synk): for large H*W add a row-tiled grid axis with a 1-row halo so a
    # whole image need not be VMEM-resident (v7x: 64 MiB physical VMEM).

    # Drop the 128-lane padding tail and the 2 width-padding columns of each row.
    # Single fused XLA slice; unavoidable while the caller needs dense NCHW.
    return out_flat[:, :, :Lout].reshape(N, Cout, H, Wp)[:, :, :, :W]


def init_params(key, input_size, output_size):
    """Synthetic ConvBlock params: Conv2d(3x3, bias=True) + PReLU(init=0.5)."""
    kw, kb = jax.random.split(key)
    fan_in = 9.0 * input_size
    w = jax.random.normal(kw, (output_size, input_size, 3, 3),
                          jnp.float32) / jnp.sqrt(fan_in)
    bound = 1.0 / jnp.sqrt(fan_in)
    b = jax.random.uniform(kb, (output_size,), jnp.float32, -bound, bound)
    return {"w": w, "b": b, "alpha": jnp.float32(0.5)}


if __name__ == "__main__":
    # N=4 so the batched grid path (nb=2 images per step, 2 parallel steps) is exercised.
    N, Cin, Cout, H, W = 4, 4, 8, 16, 16
    key = jax.random.PRNGKey(0)
    kx, kp = jax.random.split(key)
    x = jax.random.normal(kx, (N, Cin, H, W), jnp.float32)
    params = init_params(kp, Cin, Cout)

    out = jax.jit(conv_block_forward)(params, x)
    out = jax.block_until_ready(out)
    assert out.shape == (N, Cout, H, W)
    assert out.dtype == jnp.float32
    assert bool(jnp.all(jnp.isfinite(out)))

    # Cross-check against XLA conv + bias + PReLU (same semantics as the module
    # with its default args: k=3, stride=1, pad=1, bias=True, prelu, no norm).
    ref = jax.lax.conv_general_dilated(
        x, params["w"], window_strides=(1, 1), padding=((1, 1), (1, 1)),
        dimension_numbers=("NCHW", "OIHW", "NCHW"),
        precision=jax.lax.Precision.HIGHEST)
    ref = ref + params["b"].reshape(1, Cout, 1, 1)
    ref = jnp.where(ref >= 0, ref, 0.5 * ref)
    err = float(jnp.max(jnp.abs(out - ref)))
    assert err < 2e-2, f"max abs err {err}"
    print("KERNEL_OK")
</pallas_src>

<mosaic_0001>
module attributes {stable_mosaic.version = 11 : i64} {
  func.func @_convblock_kernel(%arg0: i32, %arg1: memref<2x8x422xf32, #tpu.memory_space<vmem>>, %arg2: memref<3x8x24xf32, #tpu.memory_space<vmem>>, %arg3: memref<8x1xf32, #tpu.memory_space<vmem>>, %arg4: memref<8x1xf32, #tpu.memory_space<vmem>>, %arg5: memref<2x8x384xf32, #tpu.memory_space<vmem>>) attributes {dimension_semantics = [#tpu.dimension_semantics<parallel>], iteration_bounds = array<i64: 2>, scalar_prefetch = 0 : i64, scratch_operands = 0 : i64, tpu.core_type = #tpu.core_type<tc>, window_params = [{transform_indices = @transform_0, window_bounds = array<i64: 2, 8, 422>}, {pipeline_mode = #tpu.pipeline_mode<synchronous>, transform_indices = @transform_1, window_bounds = array<i64: 3, 8, 24>}, {pipeline_mode = #tpu.pipeline_mode<synchronous>, transform_indices = @transform_2, window_bounds = array<i64: 8, 1>}, {pipeline_mode = #tpu.pipeline_mode<synchronous>, transform_indices = @transform_3, window_bounds = array<i64: 8, 1>}, {transform_indices = @transform_4, window_bounds = array<i64: 2, 8, 384>}]} {
    %c0 = arith.constant 0 : index
    %c0_0 = arith.constant 0 : index
    %0 = vector.load %arg3[%c0, %c0_0] : memref<8x1xf32, #tpu.memory_space<vmem>>, vector<8x1xf32>
    %c0_1 = arith.constant 0 : index
    %c0_2 = arith.constant 0 : index
    %1 = vector.load %arg4[%c0_1, %c0_2] : memref<8x1xf32, #tpu.memory_space<vmem>>, vector<8x1xf32>
    %c0_3 = arith.constant 0 : index
    %c0_4 = arith.constant 0 : index
    %c0_5 = arith.constant 0 : index
    %2 = vector.load %arg1[%c0_3, %c0_4, %c0_5] : memref<2x8x422xf32, #tpu.memory_space<vmem>>, vector<1x8x422xf32>
    %3 = vector.shape_cast %2 : vector<1x8x422xf32> to vector<8x422xf32>
    %4 = vector.extract_strided_slice %3 {offsets = [0, 0], sizes = [8, 384], strides = [1, 1]} : vector<8x422xf32> to vector<8x384xf32>
    %5 = vector.extract_strided_slice %3 {offsets = [0, 1], sizes = [8, 384], strides = [1, 1]} : vector<8x422xf32> to vector<8x384xf32>
    %6 = vector.extract_strided_slice %3 {offsets = [0, 2], sizes = [8, 384], strides = [1, 1]} : vector<8x422xf32> to vector<8x384xf32>
    %7 = tpu.concatenate %4, %5, %6 in 0 : vector<8x384xf32>, vector<8x384xf32>, vector<8x384xf32> -> vector<24x384xf32>
    %c0_6 = arith.constant 0 : index
    %c0_7 = arith.constant 0 : index
    %c0_8 = arith.constant 0 : index
    %8 = vector.load %arg2[%c0_6, %c0_7, %c0_8] : memref<3x8x24xf32, #tpu.memory_space<vmem>>, vector<1x8x24xf32>
    %9 = vector.shape_cast %8 : vector<1x8x24xf32> to vector<8x24xf32>
    %cst = arith.constant dense<0.000000e+00> : vector<8x384xf32>
    %10 = tpu.matmul %9, %7, %cst {dimension_numbers = #tpu.dot_dimension_numbers<[1], [0], [0], [1], [0, 0, 1, 1], [], []>} : vector<8x24xf32>, vector<24x384xf32>, vector<8x384xf32> -> vector<8x384xf32>
    %11 = vector.extract_strided_slice %3 {offsets = [0, 18], sizes = [8, 384], strides = [1, 1]} : vector<8x422xf32> to vector<8x384xf32>
    %12 = vector.extract_strided_slice %3 {offsets = [0, 19], sizes = [8, 384], strides = [1, 1]} : vector<8x422xf32> to vector<8x384xf32>
    %13 = vector.extract_strided_slice %3 {offsets = [0, 20], sizes = [8, 384], strides = [1, 1]} : vector<8x422xf32> to vector<8x384xf32>
    %14 = tpu.concatenate %11, %12, %13 in 0 : vector<8x384xf32>, vector<8x384xf32>, vector<8x384xf32> -> vector<24x384xf32>
    %c1 = arith.constant 1 : index
    %c0_9 = arith.constant 0 : index
    %c0_10 = arith.constant 0 : index
    %15 = vector.load %arg2[%c1, %c0_9, %c0_10] : memref<3x8x24xf32, #tpu.memory_space<vmem>>, vector<1x8x24xf32>
    %16 = vector.shape_cast %15 : vector<1x8x24xf32> to vector<8x24xf32>
    %cst_11 = arith.constant dense<0.000000e+00> : vector<8x384xf32>
    %17 = tpu.matmul %16, %14, %cst_11 {dimension_numbers = #tpu.dot_dimension_numbers<[1], [0], [0], [1], [0, 0, 1, 1], [], []>} : vector<8x24xf32>, vector<24x384xf32>, vector<8x384xf32> -> vector<8x384xf32>
    %18 = arith.addf %10, %17 : vector<8x384xf32>
    %19 = vector.extract_strided_slice %3 {offsets = [0, 36], sizes = [8, 384], strides = [1, 1]} : vector<8x422xf32> to vector<8x384xf32>
    %20 = vector.extract_strided_slice %3 {offsets = [0, 37], sizes = [8, 384], strides = [1, 1]} : vector<8x422xf32> to vector<8x384xf32>
    %21 = vector.extract_strided_slice %3 {offsets = [0, 38], sizes = [8, 384], strides = [1, 1]} : vector<8x422xf32> to vector<8x384xf32>
    %22 = tpu.concatenate %19, %20, %21 in 0 : vector<8x384xf32>, vector<8x384xf32>, vector<8x384xf32> -> vector<24x384xf32>
    %c2 = arith.constant 2 : index
    %c0_12 = arith.constant 0 : index
    %c0_13 = arith.constant 0 : index
    %23 = vector.load %arg2[%c2, %c0_12, %c0_13] : memref<3x8x24xf32, #tpu.memory_space<vmem>>, vector<1x8x24xf32>
    %24 = vector.shape_cast %23 : vector<1x8x24xf32> to vector<8x24xf32>
    %cst_14 = arith.constant dense<0.000000e+00> : vector<8x384xf32>
    %25 = tpu.matmul %24, %22, %cst_14 {dimension_numbers = #tpu.dot_dimension_numbers<[1], [0], [0], [1], [0, 0, 1, 1], [], []>} : vector<8x24xf32>, vector<24x384xf32>, vector<8x384xf32> -> vector<8x384xf32>
    %26 = arith.addf %18, %25 : vector<8x384xf32>
    %27 = vector.broadcast %0 : vector<8x1xf32> to vector<8x384xf32>
    %28 = arith.addf %26, %27 : vector<8x384xf32>
    %cst_15 = arith.constant 0.000000e+00 : f32
    %29 = vector.broadcast %cst_15 : f32 to vector<8x384xf32>
    %30 = arith.cmpf oge, %28, %29 : vector<8x384xf32>
    %31 = vector.broadcast %1 : vector<8x1xf32> to vector<8x384xf32>
    %32 = arith.mulf %31, %28 : vector<8x384xf32>
    %33 = arith.select %30, %28, %32 : vector<8x384xi1>, vector<8x384xf32>
    %c0_16 = arith.constant 0 : index
    %c0_17 = arith.constant 0 : index
    %c0_18 = arith.constant 0 : index
    %34 = vector.load %arg5[%c0_16, %c0_17, %c0_18] : memref<2x8x384xf32, #tpu.memory_space<vmem>>, vector<1x8x384xf32>
    %35 = vector.shape_cast %34 : vector<1x8x384xf32> to vector<8x384xf32>
    %36 = vector.shape_cast %33 : vector<8x384xf32> to vector<1x8x384xf32>
    tpu.vector_store %arg5[%c0_16, %c0_17, %c0_18], %36 {strides = array<i32>} : memref<2x8x384xf32, #tpu.memory_space<vmem>>, vector<1x8x384xf32>,
    %c1_19 = arith.constant 1 : index
    %c0_20 = arith.constant 0 : index
    %c0_21 = arith.constant 0 : index
    %37 = vector.load %arg1[%c1_19, %c0_20, %c0_21] : memref<2x8x422xf32, #tpu.memory_space<vmem>>, vector<1x8x422xf32>
    %38 = vector.shape_cast %37 : vector<1x8x422xf32> to vector<8x422xf32>
    %39 = vector.extract_strided_slice %38 {offsets = [0, 0], sizes = [8, 384], strides = [1, 1]} : vector<8x422xf32> to vector<8x384xf32>
    %40 = vector.extract_strided_slice %38 {offsets = [0, 1], sizes = [8, 384], strides = [1, 1]} : vector<8x422xf32> to vector<8x384xf32>
    %41 = vector.extract_strided_slice %38 {offsets = [0, 2], sizes = [8, 384], strides = [1, 1]} : vector<8x422xf32> to vector<8x384xf32>
    %42 = tpu.concatenate %39, %40, %41 in 0 : vector<8x384xf32>, vector<8x384xf32>, vector<8x384xf32> -> vector<24x384xf32>
    %c0_22 = arith.constant 0 : index
    %c0_23 = arith.constant 0 : index
    %c0_24 = arith.constant 0 : index
    %43 = vector.load %arg2[%c0_22, %c0_23, %c0_24] : memref<3x8x24xf32, #tpu.memory_space<vmem>>, vector<1x8x24xf32>
    %44 = vector.shape_cast %43 : vector<1x8x24xf32> to vector<8x24xf32>
    %cst_25 = arith.constant dense<0.000000e+00> : vector<8x384xf32>
    %45 = tpu.matmul %44, %42, %cst_25 {dimension_numbers = #tpu.dot_dimension_numbers<[1], [0], [0], [1], [0, 0, 1, 1], [], []>} : vector<8x24xf32>, vector<24x384xf32>, vector<8x384xf32> -> vector<8x384xf32>
    %46 = vector.extract_strided_slice %38 {offsets = [0, 18], sizes = [8, 384], strides = [1, 1]} : vector<8x422xf32> to vector<8x384xf32>
    %47 = vector.extract_strided_slice %38 {offsets = [0, 19], sizes = [8, 384], strides = [1, 1]} : vector<8x422xf32> to vector<8x384xf32>
    %48 = vector.extract_strided_slice %38 {offsets = [0, 20], sizes = [8, 384], strides = [1, 1]} : vector<8x422xf32> to vector<8x384xf32>
    %49 = tpu.concatenate %46, %47, %48 in 0 : vector<8x384xf32>, vector<8x384xf32>, vector<8x384xf32> -> vector<24x384xf32>
    %c1_26 = arith.constant 1 : index
    %c0_27 = arith.constant 0 : index
    %c0_28 = arith.constant 0 : index
    %50 = vector.load %arg2[%c1_26, %c0_27, %c0_28] : memref<3x8x24xf32, #tpu.memory_space<vmem>>, vector<1x8x24xf32>
    %51 = vector.shape_cast %50 : vector<1x8x24xf32> to vector<8x24xf32>
    %cst_29 = arith.constant dense<0.000000e+00> : vector<8x384xf32>
    %52 = tpu.matmul %51, %49, %cst_29 {dimension_numbers = #tpu.dot_dimension_numbers<[1], [0], [0], [1], [0, 0, 1, 1], [], []>} : vector<8x24xf32>, vector<24x384xf32>, vector<8x384xf32> -> vector<8x384xf32>
    %53 = arith.addf %45, %52 : vector<8x384xf32>
    %54 = vector.extract_strided_slice %38 {offsets = [0, 36], sizes = [8, 384], strides = [1, 1]} : vector<8x422xf32> to vector<8x384xf32>
    %55 = vector.extract_strided_slice %38 {offsets = [0, 37], sizes = [8, 384], strides = [1, 1]} : vector<8x422xf32> to vector<8x384xf32>
    %56 = vector.extract_strided_slice %38 {offsets = [0, 38], sizes = [8, 384], strides = [1, 1]} : vector<8x422xf32> to vector<8x384xf32>
    %57 = tpu.concatenate %54, %55, %56 in 0 : vector<8x384xf32>, vector<8x384xf32>, vector<8x384xf32> -> vector<24x384xf32>
    %c2_30 = arith.constant 2 : index
    %c0_31 = arith.constant 0 : index
    %c0_32 = arith.constant 0 : index
    %58 = vector.load %arg2[%c2_30, %c0_31, %c0_32] : memref<3x8x24xf32, #tpu.memory_space<vmem>>, vector<1x8x24xf32>
    %59 = vector.shape_cast %58 : vector<1x8x24xf32> to vector<8x24xf32>
    %cst_33 = arith.constant dense<0.000000e+00> : vector<8x384xf32>
    %60 = tpu.matmul %59, %57, %cst_33 {dimension_numbers = #tpu.dot_dimension_numbers<[1], [0], [0], [1], [0, 0, 1, 1], [], []>} : vector<8x24xf32>, vector<24x384xf32>, vector<8x384xf32> -> vector<8x384xf32>
    %61 = arith.addf %53, %60 : vector<8x384xf32>
    %62 = vector.broadcast %0 : vector<8x1xf32> to vector<8x384xf32>
    %63 = arith.addf %61, %62 : vector<8x384xf32>
    %cst_34 = arith.constant 0.000000e+00 : f32
    %64 = vector.broadcast %cst_34 : f32 to vector<8x384xf32>
    %65 = arith.cmpf oge, %63, %64 : vector<8x384xf32>
    %66 = vector.broadcast %1 : vector<8x1xf32> to vector<8x384xf32>
    %67 = arith.mulf %66, %63 : vector<8x384xf32>
    %68 = arith.select %65, %63, %67 : vector<8x384xi1>, vector<8x384xf32>
    %c1_35 = arith.constant 1 : index
    %c0_36 = arith.constant 0 : index
    %c0_37 = arith.constant 0 : index
    %69 = vector.load %arg5[%c1_35, %c0_36, %c0_37] : memref<2x8x384xf32, #tpu.memory_space<vmem>>, vector<1x8x384xf32>
    %70 = vector.shape_cast %69 : vector<1x8x384xf32> to vector<8x384xf32>
    %71 = vector.shape_cast %68 : vector<8x384xf32> to vector<1x8x384xf32>
    tpu.vector_store %arg5[%c1_35, %c0_36, %c0_37], %71 {strides = array<i32>} : memref<2x8x384xf32, #tpu.memory_space<vmem>>, vector<1x8x384xf32>,
    return
  }
  func.func @transform_0(%arg0: i32) -> (i32, i32, i32) {
    %c0_i32 = arith.constant 0 : i32
    %c0_i32_0 = arith.constant 0 : i32
    %c0_i32_1 = arith.constant 0 : i32
    return %arg0, %c0_i32, %c0_i32_0 : i32, i32, i32
  }
  func.func @transform_1(%arg0: i32) -> (i32, i32, i32) {
    %c0_i32 = arith.constant 0 : i32
    %c0_i32_0 = arith.constant 0 : i32
    %c0_i32_1 = arith.constant 0 : i32
    %c0_i32_2 = arith.constant 0 : i32
    return %c0_i32, %c0_i32_0, %c0_i32_1 : i32, i32, i32
  }
  func.func @transform_2(%arg0: i32) -> (i32, i32) {
    %c0_i32 = arith.constant 0 : i32
    %c0_i32_0 = arith.constant 0 : i32
    %c0_i32_1 = arith.constant 0 : i32
    return %c0_i32, %c0_i32_0 : i32, i32
  }
  func.func @transform_3(%arg0: i32) -> (i32, i32) {
    %c0_i32 = arith.constant 0 : i32
    %c0_i32_0 = arith.constant 0 : i32
    %c0_i32_1 = arith.constant 0 : i32
    return %c0_i32, %c0_i32_0 : i32, i32
  }
  func.func @transform_4(%arg0: i32) -> (i32, i32, i32) {
    %c0_i32 = arith.constant 0 : i32
    %c0_i32_0 = arith.constant 0 : i32
    %c0_i32_1 = arith.constant 0 : i32
    return %arg0, %c0_i32, %c0_i32_0 : i32, i32, i32
  }
}

</mosaic_0001>

<bundles_post_ra>
// kernel: conv_block_forward.1
= control target key start
LH: loop header
LB: loop body
LE: loop exit
PB: predicated region body
PF: predicated region fallthrough
CT: control target
= control target key end

     0   :  { %s1201_s15 = smov 0   ;;  %s1473_s0 = inlined_call_operand.vmem [shape: f32[4,8,422], index: 0, kind: input, shape index: {}]   ;;  %s1474_s1 = inlined_call_operand.vmem [shape: f32[3,8,24], index: 1, kind: input, shape index: {}]   ;;  %s1475_s2 = inlined_call_operand.vmem [shape: f32[8,1], index: 2, kind: input, shape index: {}]   ;;  %s1476_s3 = inlined_call_operand.vmem [shape: f32[8,1], index: 3, kind: input, shape index: {}]   ;;  %s1477_s4 = inlined_call_operand.vmem [shape: f32[4,8,384], index: 4, kind: output, shape index: {}]  }
   0x1 LB: > { %s945_s16 = sadd.s32 4294967295, %s1169_s15   ;;  %p949_p0 = scmp.ge.s32.totalorder %s1169_s15, 1  ;;  %s1169_s15 = sphi %s1201_s15, %s14_s15  }
   0x2   : > { %p164_p1 = scmp.lt.s32.totalorder %s1169_s15, 3 }
   0x4   : > { %p165_p2 = pnand %p949_p0, %p164_p1 }
   0x5   : > { %s950_s17 = sshll.u32 (!%p165_p2), %s945_s16, 1  ;;  %s1171_s22 = smov (!%p165_p2), 127  }
   0x6   : > { %168 = sbr.rel (%p165_p2) target bundleno = 449 (0x1c1), region = 36  ;;  %p193_p3 = scmp.lt.s32.totalorder (!%p165_p2), %s950_s17, 3 }
   0x7   : > { %s1172_s23 = smov (!%p165_p2), 126   ;;  %s1173_s24 = smov (!%p165_p2), 110  }
   0x8   : > { %s1174_s25 = smov (!%p165_p2), 92  }
   0xb   : > { %s1479_s17 = smov (!%p193_p3, %s950_s17), 3  ;;  %vm239_vm0 = vcmask 1031168   ;;  %vm224_vm1 = vcmask 1039360   ;;  %vm273_vm2 = vcmask 900096   ;;  %vm292_vm3 = vcmask 195584  }
   0xc   : > { %s986_s18 = sshll.u32 %s1479_s17, 5  ;;  %vm445_vm4 = vcmask 752640   ;;  %s987_s10 = smul.u32 24, %s1479_s17 }
   0xd   : > { %s197_s21 = scalar_lea.vmem %s1473_s0, %s986_s18 }
   0xe   : > { %v1215_v0 = vld [vmem:[%s197_s21] sm:$0xff]  ;;  %v1217_v1 = vld [vmem:[%s197_s21 + $0x8] sm:$0xff]  ;;  %v1229_v6 = vld [vmem:[%s197_s21 + $0x10] sm:$0xff]  ;;  %s1462_s13 = scalar_lea.vmem %s1477_s4, %s987_s10 }
   0xf   : > { %v1011_v2 = vpack.i.bf16 %v1217_v1, %v1215_v0  ;;  %v1221_v3 = vld [vmem:[%s197_s21 + $0x20] sm:$0xff]  ;;  %v1223_v4 = vld [vmem:[%s197_s21 + $0x28] sm:$0xff]  ;;  %v1231_v7 = vld [vmem:[%s197_s21 + $0x18] sm:$0xff] }
  0x10   : > { %v1227_v5 = vpack.i.bf16 %v1223_v4, %v1221_v3  ;;  %v1016_v8 = vpack.i.bf16 %v1231_v7, %v1229_v6  ;;  %v1236_v9 = vld [vmem:[%s197_s21 + $0x30] sm:$0xff]  ;;  %v1238_v10 = vld [vmem:[%s197_s21 + $0x38] sm:$0xff] }
  0x11   : > { %1012 = vrot.lane.b32.xlu1 %v1011_v2, %s1171_s22  ;;  %1002 = vrot.lane.b32.xlu0 %v1011_v2, %s1172_s23  ;;  %v1242_v11 = vpack.i.bf16 %v1238_v10, %v1236_v9  ;;  %v1096_v55 = vpack.i.bf16 %v1236_v9, %v1223_v4 }
  0x12   : > { %1022 = vrot.lane.b32.xlu2 %v1227_v5, %s1172_s23 }
  0x19   : > { %1017 = vrot.lane.b32.xlu1 %v1016_v8, %s1171_s22  ;;  %1007 = vrot.lane.b32.xlu0 %v1016_v8, %s1172_s23 }
  0x1a   : > { %1027 = vrot.lane.b32.xlu2 %v1242_v11, %s1172_s23 }
  0x21   : > { %1032 = vrot.lane.b32.xlu0 %v1227_v5, %s1171_s22  ;;  %1037 = vrot.lane.b32.xlu1 %v1242_v11, %s1171_s22 }
  0x29   : > { %1047 = vrot.lane.b32.xlu1 %v1016_v8, %s1173_s24  ;;  %1042 = vrot.lane.b32.xlu0 %v1011_v2, %s1173_s24 }
  0x6c   : > { %v1023_v18 = vpop.permute.xlu2 %1022 }
  0x6d   : > { %v1025_v38 = vunpack.i.h.bf16 %v1023_v18  ;;  %v1024_v39 = vunpack.i.l.bf16 %v1023_v18 }
  0x6f   : > { %v1275_v42 = vsel %vm239_vm0, %v1024_v39, %v1025_v38 }
  0x74   : > { %v1028_v29 = vpop.permute.xlu2 %1027 }
  0x75   : > { %v1030_v32 = vunpack.i.h.bf16 %v1028_v29  ;;  %v1029_v40 = vunpack.i.l.bf16 %v1028_v29 }
  0x77   : > { %v1071_v34 = vpack.i.bf16 %v1221_v3, %v1030_v32  ;;  %v1278_v43 = vsel %vm239_vm0, %v1025_v38, %v1029_v40  ;;  %v1313_v60 = vsel %vm239_vm0, %v1029_v40, %v1030_v32 }
  0x78   : > { %v1111_v49 = vpack.i.bf16 %v1278_v43, %v1275_v42 }
  0x83   : > { %v1013_v12 = vpop.permute.xlu1 %1012  ;;  %v1003_v13 = vpop.permute.xlu0 %1002 }
  0x84   : > { %v1015_v14 = vunpack.i.h.bf16 %v1013_v12  ;;  %v1014_v15 = vunpack.i.l.bf16 %v1013_v12  ;;  %v1005_v16 = vunpack.i.h.bf16 %v1003_v13  ;;  %v1004_v17 = vunpack.i.l.bf16 %v1003_v13 }
  0x86   : > { %v240_v19 = vsel %vm239_vm0, %v1004_v17, %v1005_v16  ;;  %v225_v20 = vsel %vm224_vm1, %v1014_v15, %v1015_v14 }
  0x87   : > { %372 = vmatpush.msra.mxu3 %v240_v19 }
  0x89   : > { %373 = vmatpush.msra.mxu3 %v225_v20 }
  0x8b   : > { %v1018_v21 = vpop.permute.xlu1 %1017  ;;  %v1008_v22 = vpop.permute.xlu0 %1007  ;;  %374 = vmatpush.msra.mxu3 %v1215_v0 }
  0x8c   : > { %v1019_v23 = vunpack.i.l.bf16 %v1018_v21  ;;  %v1010_v24 = vunpack.i.h.bf16 %v1008_v22  ;;  %v1009_v25 = vunpack.i.l.bf16 %v1008_v22  ;;  %v1020_v37 = vunpack.i.h.bf16 %v1018_v21 }
  0x8e   : > { %v1051_v26 = vpack.i.bf16 %v1010_v24, %v1229_v6  ;;  %v1254_v27 = vsel %vm224_vm1, %v1015_v14, %v1019_v23  ;;  %v1257_v28 = vsel %vm239_vm0, %v1005_v16, %v1009_v25  ;;  %v1265_v33 = vsel %vm239_vm0, %v1009_v25, %v1010_v24 }
  0x8f   : > { %v1076_v30 = vpack.i.bf16 %v1254_v27, %v225_v20  ;;  %v1056_v31 = vpack.i.bf16 %v1257_v28, %v240_v19  ;;  %v1061_v35 = vpack.i.bf16 %v1010_v24, %v1265_v33  ;;  %v1101_v36 = vpack.i.bf16 %v1215_v0, %v1265_v33  ;;  %v1347_v24 = vld [vmem:[%s1474_s1 + $0x8] sm:$0xff] }
  0x90   : > { %1052 = vrot.lane.b32.xlu0 %v1051_v26, %s1174_s25  ;;  %v1281_v44 = vsel %vm224_vm1, %v1019_v23, %v1020_v37  ;;  %v1066_v46 = vpack.i.bf16 %v1231_v7, %v1020_v37  ;;  %v1146_v0 = vpack.i.bf16 %v1030_v32, %v1313_v60 }
  0x91   : > { %1077 = vrot.lane.b32.xlu1 %v1076_v30, %s1173_s24  ;;  %1057 = vrot.lane.b32.xlu2 %v1056_v31, %s1173_s24  ;;  %v1081_v50 = vpack.i.bf16 %v1020_v37, %v1281_v44  ;;  %v1106_v57 = vpack.i.bf16 %v1281_v44, %v1217_v1 }
  0x93   : > { %v1038_v41 = vpop.permute.xlu1 %1037  ;;  %v1033_v45 = vpop.permute.xlu0 %1032 }
  0x94   : > { %v1040_v47 = vunpack.i.h.bf16 %v1038_v41  ;;  %v1039_v48 = vunpack.i.l.bf16 %v1038_v41  ;;  %v1035_v51 = vunpack.i.h.bf16 %v1033_v45  ;;  %v1034_v58 = vunpack.i.l.bf16 %v1033_v45 }
  0x96   : > { %v1291_v52 = vsel %vm224_vm1, %v1035_v51, %v1039_v48  ;;  %v1294_v53 = vsel %vm224_vm1, %v1039_v48, %v1040_v47  ;;  %v1126_v56 = vpack.i.bf16 %v1238_v10, %v1040_v47  ;;  %v1310_v59 = vsel %vm224_vm1, %v1034_v58, %v1035_v51 }
  0x97   : > { %v1121_v54 = vpack.i.bf16 %v1294_v53, %v1291_v52  ;;  %v1141_v61 = vpack.i.bf16 %v1291_v52, %v1310_v59  ;;  %v1116_v62 = vpack.i.bf16 %v1310_v59, %v1313_v60  ;;  %v1151_v63 = vpack.i.bf16 %v1040_v47, %v1294_v53 }
  0x98   : > { %1062 = vrot.lane.b32.xlu0 %v1061_v35, %s1173_s24 }
  0x99   : > { %1102 = vrot.lane.b32.xlu1 %v1101_v36, %s1174_s25  ;;  %1072 = vrot.lane.b32.xlu2 %v1071_v34, %s1173_s24 }
  0x9b   : > { %v1043_v12 = vpop.permute.xlu0 %1042  ;;  %v1048_v13 = vpop.permute.xlu1 %1047 }
  0x9c   : > { %v1045_v18 = vunpack.i.h.bf16 %v1043_v12  ;;  %v1044_v19 = vunpack.i.l.bf16 %v1043_v12  ;;  %v1049_v38 = vunpack.i.l.bf16 %v1048_v13  ;;  %v1050_v40 = vunpack.i.h.bf16 %v1048_v13 }
  0x9e   : > { %v274_v23 = vsel %vm273_vm2, %v1044_v19, %v1045_v18 }
  0xa0   : > { %1067 = vrot.lane.b32.xlu0 %v1066_v46, %s1174_s25 }
  0xa1   : > { %1112 = vrot.lane.b32.xlu1 %v1111_v49, %s1173_s24  ;;  %1082 = vrot.lane.b32.xlu2 %v1081_v50, %s1173_s24  ;;  %v1175_v50 = vmov 0  }
  0xa2   : > { %1162 = vset.pattern.permute.xlu0 %v1175_v50  ;;  %1161 = vset.pattern.permute.xlu2 %v1175_v50 }
  0xa8   : > { %1092 = vrot.lane.b32.xlu0 %v1076_v30, %s1174_s25 }
  0xa9   : > { %1122 = vrot.lane.b32.xlu1 %v1121_v54, %s1173_s24  ;;  %1087 = vrot.lane.b32.xlu2 %v1056_v31, %s1174_s25 }
  0xb0   : > { %1097 = vrot.lane.b32.xlu0 %v1096_v55, %s1173_s24 }
  0xb1   : > { %1127 = vrot.lane.b32.xlu1 %v1126_v56, %s1173_s24  ;;  %1107 = vrot.lane.b32.xlu2 %v1106_v57, %s1174_s25 }
  0xb8   : > { %1142 = vrot.lane.b32.xlu0 %v1141_v61, %s1174_s25 }
  0xb9   : > { %1132 = vrot.lane.b32.xlu1 %v1227_v5, %s1174_s25  ;;  %1117 = vrot.lane.b32.xlu2 %v1116_v62, %s1173_s24 }
  0xc0   : > { %1152 = vrot.lane.b32.xlu0 %v1151_v63, %s1174_s25 }
  0xc1   : > { %1157 = vrot.lane.b32.xlu1 %v1242_v11, %s1174_s25  ;;  %1137 = vrot.lane.b32.xlu2 %v1111_v49, %s1174_s25  ;;  %v1336_v11 = vld [vmem:[%s1474_s1] sm:$0xff]  ;;  %v275_v49 = vsel %vm273_vm2, %v1045_v18, %v1049_v38 }
  0xc2   : > { %959 = vmatmul.msk.f32.vlgmr.msra.gmra.mxu3 %vm292_vm3, %v1336_v11 }
  0xc9   : > { %1147 = vrot.lane.b32.xlu2 %v1146_v0, %s1174_s25 }
  0xeb   : > { %v1058_v2 = vpop.permute.xlu2 %1057 }
  0xec   : > { %v1060_v7 = vunpack.i.h.bf16 %v1058_v2  ;;  %v1059_v8 = vunpack.i.l.bf16 %v1058_v2 }
  0xee   : > { %v280_v5 = vsel %vm273_vm2, %v1059_v8, %v1060_v7 }
  0xef   : > { %309 = vmatpush.msra.mxu0 %v280_v5 }
  0xf3   : > { %v1331_v10 = vpop.permute.xlu2 %1072 }
  0xfb   : > { %v1083_v14 = vpop.permute.xlu2 %1082 }
  0xfc   : > { %v1085_v26 = vunpack.i.h.bf16 %v1083_v14  ;;  %v1084_v34 = vunpack.i.l.bf16 %v1083_v14 }
  0xfe   : > { %v279_v48 = vsel %vm273_vm2, %v1084_v34, %v1085_v26 }
 0x102   : > { %v1340_v15 = vpop.permute.xlu0 %1052 }
 0x103   : > { %v1078_v16 = vpop.permute.xlu1 %1077  ;;  %v1088_v17 = vpop.permute.xlu2 %1087  ;;  %v1055_v35 = vunpack.i.h.bf16 %v1340_v15  ;;  %v1054_v0 = vunpack.i.l.bf16 %v1340_v15 }
 0x104   : > { %v1080_v20 = vunpack.i.h.bf16 %v1078_v16  ;;  %v1079_v21 = vunpack.i.l.bf16 %v1078_v16  ;;  %v1090_v36 = vunpack.i.h.bf16 %v1088_v17  ;;  %v1089_v46 = vunpack.i.l.bf16 %v1088_v17 }
 0x106   : > { %v277_v22 = vsel %vm273_vm2, %v1079_v21, %v1080_v20  ;;  %v278_v47 = vsel %vm273_vm2, %v1080_v20, %v1084_v34  ;;  %v452_v61 = vsel %vm445_vm4, %v1089_v46, %v1090_v36  ;;  %v1074_v21 = vunpack.i.l.bf16 %v1331_v10 }
 0x107   : > { %310 = vmatpush.msra.mxu0 %v277_v22 }
 0x109   : > { %311 = vmatpush.msra.mxu0 %v274_v23 }
 0x10a   : > { %v1063_v25 = vpop.permute.xlu0 %1062  ;;  %956 = vmatmul.msk.f32.vlgmr.msra.gmra.mxu0 %vm292_vm3, %v1347_v24 }
 0x10b   : > { %392 = vmatpush.msrb.mxu0 %v1257_v28  ;;  %v1065_v29 = vunpack.i.h.bf16 %v1063_v25  ;;  %v1064_v30 = vunpack.i.l.bf16 %v1063_v25  ;;  %v1350_v31 = vpop.permute.xlu1 %1102  ;;  %v1352_v32 = vpop.permute.xlu2 %1107 }
 0x10c   : > { %v1104_v37 = vunpack.i.l.bf16 %v1350_v31  ;;  %v1110_v54 = vunpack.i.h.bf16 %v1352_v32  ;;  %v1105_v5 = vunpack.i.h.bf16 %v1350_v31  ;;  %v1109_v12 = vunpack.i.l.bf16 %v1352_v32 }
 0x10d   : > { %393 = vmatpush.msrb.mxu0 %v1254_v27  ;;  %v281_v28 = vsel %vm273_vm2, %v1060_v7, %v1064_v30  ;;  %v282_v39 = vsel %vm273_vm2, %v1064_v30, %v1065_v29  ;;  %v207_v27 = vld [vmem:[%s1476_s3] sm:$0xff]  ;;  %v1075_v30 = vunpack.i.h.bf16 %v1331_v10 }
 0x10e   : > { %329 = vmatpush.msra.mxu1 %v281_v28  ;;  %349 = vmatpush.msra.mxu2 %v282_v39  ;;  %v453_v41 = vsel %vm445_vm4, %v1090_v36, %v1104_v37  ;;  %v454_v45 = vsel %vm445_vm4, %v1104_v37, %v1055_v35  ;;  %v446_v23 = vsel %vm445_vm4, %v1105_v5, %v1109_v12 }
 0x10f   : > { %394 = vmatpush.msrb.mxu0 %v1217_v1  ;;  %500 = vmatpush.msrb.mxu3 %v453_v41  ;;  %v276_v1 = vsel %vm273_vm2, %v1049_v38, %v1050_v40  ;;  %v447_v25 = vsel %vm445_vm4, %v1109_v12, %v1054_v0 }
 0x110   : > { %330 = vmatpush.msra.mxu1 %v278_v47  ;;  %350 = vmatpush.msra.mxu2 %v279_v48 }
 0x111   : > { %520 = vmatpush.msra.mxu0 %v454_v45  ;;  %543 = vperm.xlu0 %1162, %v207_v27  }
 0x112   : > { %v1068_v51 = vpop.permute.xlu0 %1067  ;;  %331 = vmatpush.msra.mxu1 %v275_v49  ;;  %351 = vmatpush.msra.mxu2 %v276_v1 }
 0x113   : > { %v1070_v55 = vunpack.i.h.bf16 %v1068_v51  ;;  %v1069_v56 = vunpack.i.l.bf16 %v1068_v51  ;;  %v1113_v57 = vpop.permute.xlu1 %1112  ;;  %v1118_v58 = vpop.permute.xlu2 %1117  ;;  %957 = vmatmul.msk.f32.vlgmr.msra.gmra.mxu1 %vm292_vm3, %v1347_v24  ;;  %958 = vmatmul.msk.f32.vlgmr.msra.gmra.mxu2 %vm292_vm3, %v1347_v24 }
 0x114   : > { %412 = vmatpush.msrb.mxu1 %v1265_v33  ;;  %v1115_v62 = vunpack.i.h.bf16 %v1113_v57  ;;  %v1114_v63 = vunpack.i.l.bf16 %v1113_v57  ;;  %480 = vmatpush.msrb.mxu2 %v452_v61  ;;  %v1120_v16 = vunpack.i.h.bf16 %v1118_v58  ;;  %v1119_v18 = vunpack.i.l.bf16 %v1118_v58 }
 0x115   : > { %v451_v2 = vsel %vm445_vm4, %v1110_v54, %v1069_v56  ;;  %v448_v7 = vsel %vm445_vm4, %v1054_v0, %v1070_v55  ;;  %960 = vmatmul.msk.f32.vlgmr.msrb.gmra.mxu0 %vm292_vm3, %v1336_v11 }
 0x116   : > { %413 = vmatpush.msrb.mxu1 %v1281_v44  ;;  %521 = vmatpush.msra.mxu0 %v451_v2  ;;  %v624_v33 = vsel %vm273_vm2, %v1114_v63, %v1115_v62  ;;  %v206_v44 = vld [vmem:[%s1475_s2] sm:$0xff]  ;;  %v626_v26 = vsel %vm273_vm2, %v1119_v18, %v1074_v21 }
 0x117   : > { %532 = vperm.xlu2 %1161, %v206_v44  }
 0x118   : > { %414 = vmatpush.msrb.mxu1 %v1229_v6  ;;  %522 = vmatpush.msra.mxu0 %v448_v7 }
 0x11a   : > { %652 = vmatpush.msra.mxu1 %v624_v33  ;;  %715 = vmatpush.msrb.mxu0 %v1275_v42  ;;  %v1093_v8 = vpop.permute.xlu0 %1092  ;;  %v1400_v42 = vld [vmem:[%s1474_s1 + $0x10] sm:$0xff] }
 0x11b   : > { %v1095_v6 = vunpack.i.h.bf16 %v1093_v8  ;;  %v1094_v13 = vunpack.i.l.bf16 %v1093_v8  ;;  %v1123_v14 = vpop.permute.xlu1 %1122  ;;  %v1392_v15 = vpop.permute.xlu2 %1137  ;;  %961 = vmatmul.msk.f32.vlgmr.msrb.gmra.mxu1 %vm292_vm3, %v1336_v11 }
 0x11c   : > { %716 = vmatpush.msrb.mxu0 %v1310_v59  ;;  %v1124_v17 = vunpack.i.l.bf16 %v1123_v14  ;;  %v1125_v22 = vunpack.i.h.bf16 %v1123_v14  ;;  %v1140_v37 = vunpack.i.h.bf16 %v1392_v15  ;;  %v1139_v46 = vunpack.i.l.bf16 %v1392_v15 }
 0x11d   : > { %v449_v19 = vsel %vm445_vm4, %v1094_v13, %v1095_v6  ;;  %v450_v20 = vsel %vm445_vm4, %v1095_v6, %v1110_v54  ;;  %965 = vmatmul.msk.f32.vlgmr.msra.gmra.mxu0 %vm292_vm3, %v1400_v42 }
 0x11e   : > { %717 = vmatpush.msrb.mxu0 %v1221_v3  ;;  %481 = vmatpush.msrb.mxu2 %v449_v19  ;;  %v621_v59 = vsel %vm273_vm2, %v1120_v16, %v1124_v17  ;;  %v625_v3 = vsel %vm273_vm2, %v1115_v62, %v1119_v18  ;;  %v622_v36 = vsel %vm273_vm2, %v1124_v17, %v1125_v22 }
 0x11f   : > { %501 = vmatpush.msrb.mxu3 %v450_v20  ;;  %653 = vmatpush.msra.mxu1 %v621_v59 }
 0x120   : > { %482 = vmatpush.msrb.mxu2 %v446_v23 }
 0x121   : > { %502 = vmatpush.msrb.mxu3 %v447_v25  ;;  %963 = vmatmul.msk.f32.vlgmr.msrb.gmra.mxu2 %vm292_vm3, %v1400_v42 }
 0x122   : > { %964 = vmatmul.msk.f32.vlgmr.msrb.gmra.mxu3 %vm292_vm3, %v1400_v42  ;;  %672 = vmatpush.msra.mxu2 %v625_v3  ;;  %v1098_v29 = vpop.permute.xlu0 %1097 }
 0x123   : > { %692 = vmatpush.msra.mxu3 %v626_v26  ;;  %v1100_v31 = vunpack.i.h.bf16 %v1098_v29  ;;  %v1099_v32 = vunpack.i.l.bf16 %v1098_v29  ;;  %v1128_v34 = vpop.permute.xlu1 %1127  ;;  %v1148_v35 = vpop.permute.xlu2 %1147 }
 0x124   : > { %v1129_v38 = vunpack.i.l.bf16 %v1128_v34  ;;  %v1149_v28 = vunpack.i.l.bf16 %v1148_v35  ;;  %673 = vmatpush.msra.mxu2 %v622_v36  ;;  %v1130_v39 = vunpack.i.h.bf16 %v1128_v34  ;;  %v1150_v47 = vunpack.i.h.bf16 %v1148_v35 }
 0x125   : > { %v618_v40 = vsel %vm273_vm2, %v1075_v30, %v1099_v32  ;;  %v619_v41 = vsel %vm273_vm2, %v1099_v32, %v1100_v31  ;;  %974 = vmatmul.msk.f32.vlgmr.msrb.gmra.mxu0 %vm292_vm3, %v1336_v11 }
 0x126   : > { %654 = vmatpush.msra.mxu1 %v618_v40  ;;  %674 = vmatpush.msra.mxu2 %v619_v41  ;;  %v623_v10 = vsel %vm273_vm2, %v1125_v22, %v1129_v38  ;;  %v794_v45 = vsel %vm445_vm4, %v1140_v37, %v1149_v28  ;;  %v620_v27 = vsel %vm273_vm2, %v1100_v31, %v1130_v39 }
 0x127   : > { %693 = vmatpush.msra.mxu3 %v623_v10  ;;  %841 = vmatpush.msra.mxu0 %v794_v45 }
 0x128   : > { %735 = vmatpush.msrb.mxu1 %v1278_v43  ;;  %755 = vmatpush.msrb.mxu2 %v1313_v60  ;;  %v793_v60 = vsel %vm445_vm4, %v1139_v46, %v1140_v37 }
 0x129   : > { %971 = vmatmul.msk.f32.vlgmr.msra.gmra.mxu1 %vm292_vm3, %v1347_v24  ;;  %972 = vmatmul.msk.f32.vlgmr.msra.gmra.mxu2 %vm292_vm3, %v1347_v24 }
 0x12a   : > { %694 = vmatpush.msra.mxu3 %v620_v27  ;;  %736 = vmatpush.msrb.mxu1 %v1291_v52  ;;  %v1143_v48 = vpop.permute.xlu0 %1142  ;;  %v795_v52 = vsel %vm445_vm4, %v1149_v28, %v1150_v47 }
 0x12b   : > { %756 = vmatpush.msrb.mxu2 %v1294_v53  ;;  %v1145_v49 = vunpack.i.h.bf16 %v1143_v48  ;;  %v1144_v43 = vunpack.i.l.bf16 %v1143_v48  ;;  %973 = vmatmul.msk.f32.vlgmr.msra.gmra.mxu3 %vm292_vm3, %v1347_v24  ;;  %v1133_v50 = vpop.permute.xlu1 %1132 }
 0x12c   : > { %821 = vmatpush.msrb.mxu3 %v793_v60  ;;  %v1135_v51 = vunpack.i.h.bf16 %v1133_v50  ;;  %v1134_v1 = vunpack.i.l.bf16 %v1133_v50  ;;  %737 = vmatpush.msrb.mxu1 %v1223_v4 }
 0x12d   : > { %v790_v53 = vsel %vm445_vm4, %v1144_v43, %v1145_v49  ;;  %757 = vmatpush.msrb.mxu2 %v1236_v9 }
 0x12e   : > { %861 = vmatpush.msra.mxu1 %v795_v52  ;;  %822 = vmatpush.msrb.mxu3 %v790_v53  ;;  %v787_v24 = vsel %vm445_vm4, %v1134_v1, %v1135_v51 }
 0x130   : > { %823 = vmatpush.msrb.mxu3 %v787_v24 }
 0x131   : > { %975 = vmatmul.msk.f32.vlgmr.msrb.gmra.mxu1 %vm292_vm3, %v1336_v11  ;;  %976 = vmatmul.msk.f32.vlgmr.msrb.gmra.mxu2 %vm292_vm3, %v1336_v11 }
 0x132   : > { %v1153_v54 = vpop.permute.xlu0 %1152 }
 0x133   : > { %v1155_v55 = vunpack.i.h.bf16 %v1153_v54  ;;  %v1154_v4 = vunpack.i.l.bf16 %v1153_v54  ;;  %978 = vmatmul.msk.f32.vlgmr.msrb.gmra.mxu3 %vm292_vm3, %v1400_v42  ;;  %v1158_v56 = vpop.permute.xlu1 %1157 }
 0x134   : > { %v1160_v57 = vunpack.i.h.bf16 %v1158_v56  ;;  %v1159_v9 = vunpack.i.l.bf16 %v1158_v56 }
 0x135   : > { %v791_v58 = vsel %vm445_vm4, %v1145_v49, %v1154_v4  ;;  %v792_v61 = vsel %vm445_vm4, %v1154_v4, %v1155_v55 }
 0x136   : > { %842 = vmatpush.msra.mxu0 %v791_v58  ;;  %862 = vmatpush.msra.mxu1 %v792_v61  ;;  %v788_v62 = vsel %vm445_vm4, %v1135_v51, %v1159_v9  ;;  %v789_v11 = vsel %vm445_vm4, %v1159_v9, %v1160_v57 }
 0x138   : > { %843 = vmatpush.msra.mxu0 %v788_v62  ;;  %863 = vmatpush.msra.mxu1 %v789_v11 }
 0x139   : > { %979 = vmatmul.msk.f32.vlgmr.msra.gmra.mxu0 %vm292_vm3, %v1400_v42  ;;  %980 = vmatmul.msk.f32.vlgmr.msra.gmra.mxu1 %vm292_vm3, %v1400_v42 }
 0x145   : > { %v376_v8 = vpop.f32.mrf.mxu3 }
 0x171   : > { %v533_v12 = vpop.permute.xlu2 %532 }
 0x183   : > { %v544_v13 = vpop.permute.xlu0 %543 }
 0x187   : > { %v313_v63 = vpop.f32.mrf.mxu0 }
 0x188   : > { %v377_v17 = vadd.f32 %v376_v8, %v313_v63 }
 0x190   : > { %v333_v0 = vpop.f32.mrf.mxu1 }
 0x192   : > { %v396_v2 = vpop.f32.mrf.mxu0 }
 0x193   : > { %v397_v16 = vadd.f32 %v396_v2, %v333_v0 }
 0x196   : > { %v353_v33 = vpop.f32.mrf.mxu2 }
 0x198   : > { %v416_v7 = vpop.f32.mrf.mxu1 }
 0x199   : > { %v417_v44 = vadd.f32 %v416_v7, %v353_v33 }
 0x19a   : > { %v524_v5 = vpop.f32.mrf.mxu0 }
 0x19b   : > { %v529_v6 = vadd.f32 %v524_v5, %v417_v44 }
 0x19d   : > { %v537_v14 = vadd.f32 %v533_v12, %v529_v6 }
 0x19f   : > { %vm540_vm5 = vcmp.ge.f32.partialorder %v537_v14, 0.0  ;;  %v548_v15 = vmul.f32 %v544_v13, %v537_v14 }
 0x1a1   : > { %v551_v42 = vsel %vm540_vm5, %v537_v14, %v548_v15 }
 0x1a2   : > { %554 = vst [vmem:[%s1462_s13 + $0x10] sm:$0xff] %v551_v42  ;;  %v719_v31 = vpop.f32.mrf.mxu0 }
 0x1a4   : > { %v484_v18 = vpop.f32.mrf.mxu2 }
 0x1a5   : > { %v504_v19 = vpop.f32.mrf.mxu3  ;;  %v527_v20 = vadd.f32 %v484_v18, %v377_v17 }
 0x1a6   : > { %v528_v59 = vadd.f32 %v504_v19, %v397_v16  ;;  %v656_v21 = vpop.f32.mrf.mxu1 }
 0x1a7   : > { %v535_v22 = vadd.f32 %v533_v12, %v527_v20  ;;  %v720_v36 = vadd.f32 %v719_v31, %v656_v21 }
 0x1a8   : > { %v536_v23 = vadd.f32 %v533_v12, %v528_v59 }
 0x1a9   : > { %vm538_vm6 = vcmp.ge.f32.partialorder %v535_v22, 0.0  ;;  %v546_v25 = vmul.f32 %v544_v13, %v535_v22 }
 0x1aa   : > { %vm539_vm7 = vcmp.ge.f32.partialorder %v536_v23, 0.0  ;;  %v547_v3 = vmul.f32 %v544_v13, %v536_v23 }
 0x1ab   : > { %v549_v26 = vsel %vm538_vm6, %v535_v22, %v546_v25 }
 0x1ac   : > { %v550_v29 = vsel %vm539_vm7, %v536_v23, %v547_v3  ;;  %552 = vst [vmem:[%s1462_s13] sm:$0xff] %v549_v26  ;;  %v676_v30 = vpop.f32.mrf.mxu2 }
 0x1ad   : > { %553 = vst [vmem:[%s1462_s13 + $0x8] sm:$0xff] %v550_v29 }
 0x1ae   : > { %v696_v32 = vpop.f32.mrf.mxu3  ;;  %v739_v34 = vpop.f32.mrf.mxu1 }
 0x1af   : > { %v740_v37 = vadd.f32 %v739_v34, %v676_v30 }
 0x1b4   : > { %v759_v35 = vpop.f32.mrf.mxu2 }
 0x1b5   : > { %v760_v38 = vadd.f32 %v759_v35, %v696_v32 }
 0x1b6   : > { %v825_v28 = vpop.f32.mrf.mxu3  ;;  %v845_v39 = vpop.f32.mrf.mxu0 }
 0x1b7   : > { %v868_v40 = vadd.f32 %v825_v28, %v720_v36  ;;  %v869_v41 = vadd.f32 %v845_v39, %v740_v37  ;;  %v865_v10 = vpop.f32.mrf.mxu1 }
 0x1b8   : > { %v870_v45 = vadd.f32 %v865_v10, %v760_v38 }
 0x1b9   : > { %v871_v46 = vadd.f32 %v868_v40, %v533_v12  ;;  %v872_v47 = vadd.f32 %v869_v41, %v533_v12 }
 0x1ba   : > { %v873_v27 = vadd.f32 %v870_v45, %v533_v12 }
 0x1bb   : > { %vm874_vm8 = vcmp.ge.f32.partialorder %v871_v46, 0.0  ;;  %v877_v48 = vmul.f32 %v871_v46, %v544_v13  ;;  %vm875_vm9 = vcmp.ge.f32.partialorder %v872_v47, 0.0  ;;  %v878_v49 = vmul.f32 %v872_v47, %v544_v13 }
 0x1bc   : > { %vm876_vm10 = vcmp.ge.f32.partialorder %v873_v27, 0.0  ;;  %v879_v43 = vmul.f32 %v873_v27, %v544_v13 }
 0x1bd   : > { %v880_v60 = vsel %vm874_vm8, %v871_v46, %v877_v48  ;;  %v881_v50 = vsel %vm875_vm9, %v872_v47, %v878_v49 }
 0x1be   : > { %981 = vst [vmem:[%s1462_s13 + $0x18] sm:$0xff] %v880_v60  ;;  %v882_v51 = vsel %vm876_vm10, %v873_v27, %v879_v43 }
 0x1bf   : > { %982 = vst [vmem:[%s1462_s13 + $0x20] sm:$0xff] %v881_v50 }
 0x1c0   : > { %983 = vst [vmem:[%s1462_s13 + $0x28] sm:$0xff] %v882_v51 }
 0x1c1 PF: > { %s14_s15 = sadd.s32 1, %s1169_s15  }
 0x1c2   : > { %p11_p4 = scmp.ge.s32.totalorder %s14_s15, 4  }
 0x1c4   :  { %13 = sbr.rel (!%p11_p4) target bundleno = 1 (0x1), region = 70 }

</bundles_post_ra>
